<compile_context>
chip_gen: v5e
topology: v5e:2x2
jax: 0.10.0
libtpu: 0.0.40
codegen_flags: <defaults>
</compile_context>

<pallas_src>
import functools
import math

import jax
import jax.numpy as jnp
from jax.experimental import pallas as pl
from jax.experimental.pallas import tpu as pltpu

EPS_LN = 1e-12            # HF BertLayerNorm eps
EPS_BN = 1e-5             # torch.nn.BatchNorm1d default eps
MASK_BIAS = -10000.0      # HF additive attention-mask bias
_VMEM_LIMIT = 48 * 1024 * 1024   # explicit scoped-VMEM budget (safe on v5e/v6e/v7x)


def _tile(dim, target, *, lane=False):
    """Largest aligned divisor of `dim` <= target, else the full dim.

    Lane dims only accept 128-multiples (or full dim); sublane dims accept
    8-multiples. Never returns a misaligned partial tile.
    """
    if dim <= target:
        return dim
    aligns = (256, 128) if lane else (256, 128, 8)
    for align in aligns:
        t = (target // align) * align
        while t >= align:
            if dim % t == 0:
                return t
            t -= align
    # TODO(synk): awkward (prime / non-8-multiple) dims fall back to the full
    # dim rather than emitting misaligned tiles; pad upstream if this is huge.
    return dim


# -------------------------------------------------- tiled dense (+activation)
def _dense_kernel(x_ref, w_ref, b_ref, o_ref, acc_ref, *, activation):
    @pl.when(pl.program_id(2) == 0)
    def _():
        acc_ref[...] = jnp.zeros_like(acc_ref)

    acc_ref[...] += jnp.dot(
        x_ref[...].astype(jnp.bfloat16),
        w_ref[...].astype(jnp.bfloat16),
        preferred_element_type=jnp.float32)

    @pl.when(pl.program_id(2) == pl.num_programs(2) - 1)
    def _():
        y = acc_ref[...] + b_ref[...].astype(jnp.float32)
        if activation == "gelu":
            # TODO(synk): HF BertIntermediate uses exact erf-GELU; tanh-approx
            # GELU (EUP-friendly) used here -> ~1e-3-level divergence.
            y = jax.nn.gelu(y, approximate=True)
        o_ref[...] = y.astype(o_ref.dtype)


def dense(x, w, b, *, activation="none", out_dtype=jnp.bfloat16,
          tm=512, tn=1024, tk=512):
    """out = act(x @ w + b); bf16 MXU inputs, f32 accumulation."""
    M, K = x.shape
    Kw, N = w.shape
    assert Kw == K
    tm = _tile(M, tm)
    tn = _tile(N, tn, lane=True)
    tk = _tile(K, tk, lane=True)
    grid = (M // tm, N // tn, K // tk)
    return pl.pallas_call(
        functools.partial(_dense_kernel, activation=activation),
        grid=grid,
        in_specs=[
            pl.BlockSpec((tm, tk), lambda i, j, k: (i, k)),
            pl.BlockSpec((tk, tn), lambda i, j, k: (k, j)),
            pl.BlockSpec((1, tn), lambda i, j, k: (0, j)),
        ],
        out_specs=pl.BlockSpec((tm, tn), lambda i, j, k: (i, j)),
        out_shape=jax.ShapeDtypeStruct((M, N), out_dtype),
        scratch_shapes=[pltpu.VMEM((tm, tn), jnp.float32)],
        compiler_params=pltpu.CompilerParams(
            dimension_semantics=("parallel", "parallel", "arbitrary"),
            vmem_limit_bytes=_VMEM_LIMIT),
    )(x, w, b.reshape(1, N))


# ---------------------- tiled dense + bias + residual + LayerNorm (fused)
def _dense_add_ln_kernel(x_ref, w_ref, b_ref, r_ref, g_ref, be_ref,
                         o_ref, acc_ref, *, eps):
    @pl.when(pl.program_id(1) == 0)
    def _():
        acc_ref[...] = jnp.zeros_like(acc_ref)

    acc_ref[...] += jnp.dot(
        x_ref[...].astype(jnp.bfloat16),
        w_ref[...].astype(jnp.bfloat16),
        preferred_element_type=jnp.float32)

    @pl.when(pl.program_id(1) == pl.num_programs(1) - 1)
    def _():
        h = (acc_ref[...] + b_ref[...].astype(jnp.float32)
             + r_ref[...].astype(jnp.float32))
        mu = jnp.mean(h, axis=-1, keepdims=True)
        var = jnp.mean(jnp.square(h - mu), axis=-1, keepdims=True)
        y = (h - mu) * jax.lax.rsqrt(var + eps)
        o_ref[...] = (y * g_ref[...] + be_ref[...]).astype(o_ref.dtype)


def dense_add_layernorm(x, w, b, residual, gamma, beta, *,
                        eps=EPS_LN, tm=512, tk=512):
    """LayerNorm((x @ w + b) + residual); N = full hidden dim (LN axis).

    Residual stream in/out is bf16; LN stats and accumulation are f32.
    """
    M, K = x.shape
    Kw, N = w.shape
    assert Kw == K
    tm = _tile(M, tm)
    tk = _tile(K, tk, lane=True)
    grid = (M // tm, K // tk)
    return pl.pallas_call(
        functools.partial(_dense_add_ln_kernel, eps=eps),
        grid=grid,
        in_specs=[
            pl.BlockSpec((tm, tk), lambda i, k: (i, k)),
            pl.BlockSpec((tk, N), lambda i, k: (k, 0)),
            pl.BlockSpec((1, N), lambda i, k: (0, 0)),
            pl.BlockSpec((tm, N), lambda i, k: (i, 0)),
            pl.BlockSpec((1, N), lambda i, k: (0, 0)),
            pl.BlockSpec((1, N), lambda i, k: (0, 0)),
        ],
        out_specs=pl.BlockSpec((tm, N), lambda i, k: (i, 0)),
        out_shape=jax.ShapeDtypeStruct((M, N), jnp.bfloat16),
        scratch_shapes=[pltpu.VMEM((tm, N), jnp.float32)],
        compiler_params=pltpu.CompilerParams(
            dimension_semantics=("parallel", "arbitrary"),
            vmem_limit_bytes=_VMEM_LIMIT),
    )(x, w, b.reshape(1, N), residual, gamma, beta)


# ------------------------------------ embedding sum + LayerNorm (fused, no 0s)
def _emb_ln_kernel(we_ref, pe_ref, te_ref, g_ref, b_ref, o_ref, *, eps):
    h = (we_ref[0].astype(jnp.float32) + pe_ref[...].astype(jnp.float32)
         + te_ref[...].astype(jnp.float32))                       # (L, D) f32
    mu = jnp.mean(h, axis=-1, keepdims=True)
    var = jnp.mean(jnp.square(h - mu), axis=-1, keepdims=True)
    y = (h - mu) * jax.lax.rsqrt(var + eps)
    o_ref[0] = (y * g_ref[...] + b_ref[...]).astype(o_ref.dtype)


def embed_layernorm(we, pe, te, gamma, beta, *, eps=EPS_LN):
    B, L, D = we.shape
    return pl.pallas_call(
        functools.partial(_emb_ln_kernel, eps=eps),
        grid=(B,),
        in_specs=[
            pl.BlockSpec((1, L, D), lambda b: (b, 0, 0)),
            pl.BlockSpec((L, D), lambda b: (0, 0)),
            pl.BlockSpec((1, D), lambda b: (0, 0)),
            pl.BlockSpec((1, D), lambda b: (0, 0)),
            pl.BlockSpec((1, D), lambda b: (0, 0)),
        ],
        out_specs=pl.BlockSpec((1, L, D), lambda b: (b, 0, 0)),
        out_shape=jax.ShapeDtypeStruct((B, L, D), jnp.bfloat16),
        compiler_params=pltpu.CompilerParams(dimension_semantics=("parallel",)),
    )(we, pe, te, gamma, beta)


# ------------------------------------------- self-attention (lane-dense QKV)
def _attn_head(qh, kh, vh, bias, scale):
    """Single-head attention; softmax normalization deferred past PV matmul."""
    s = jax.lax.dot_general(                       # q @ k^T  (L, L) f32
        qh, kh, (((1,), (1,)), ((), ())),
        preferred_element_type=jnp.float32)
    s = s * scale + bias
    p = jnp.exp(s - jnp.max(s, axis=-1, keepdims=True))
    l = jnp.sum(p, axis=-1, keepdims=True)
    ctx = jnp.dot(p.astype(vh.dtype), vh, preferred_element_type=jnp.float32)
    return ctx * pl.reciprocal(l, approx=True)     # (L, dh) mul, not (L, L)


def _attn_group_kernel(q_ref, k_ref, v_ref, bias_ref, o_ref, *,
                       heads_per_group, scale):
    gw = q_ref.shape[2]
    dh = gw // heads_per_group
    bias = bias_ref[0]                             # (1, L) f32 additive mask
    for h in range(heads_per_group):               # small static loop
        sl = slice(h * dh, (h + 1) * dh)
        ctx = _attn_head(q_ref[0, :, sl], k_ref[0, :, sl], v_ref[0, :, sl],
                         bias, scale)
        o_ref[0, :, sl] = ctx.astype(o_ref.dtype)  # retire per-head temps early


def _attn_full_kernel(qkv_ref, bias_ref, o_ref, *, num_heads, scale):
    D = qkv_ref.shape[2] // 3
    dh = D // num_heads
    qkv = qkv_ref[0]                               # (L, 3D) bf16
    bias = bias_ref[0]
    for h in range(num_heads):
        ctx = _attn_head(qkv[:, h * dh:(h + 1) * dh],
                         qkv[:, D + h * dh:D + (h + 1) * dh],
                         qkv[:, 2 * D + h * dh:2 * D + (h + 1) * dh],
                         bias, scale)
        o_ref[0, :, h * dh:(h + 1) * dh] = ctx.astype(o_ref.dtype)


def attention(qkv, mask_bias, *, num_heads):
    """qkv: (B, L, 3D) bf16 (packed Q|K|V); mask_bias: (B, 1, L) f32."""
    B, L, D3 = qkv.shape
    D = D3 // 3
    dh = D // num_heads
    scale = 1.0 / math.sqrt(dh)
    # TODO(synk): flash-style query tiling (online softmax) still needed for
    # very long sequences; current kernels hold (L, L) scores per head in VMEM.
    # Smallest head group whose lane width is a multiple of 128 (lane-dense,
    # (8,128)-aligned blocks; extra parallel grid axis for v7x's two TCs).
    hg = None
    for cand in range(1, num_heads + 1):
        if num_heads % cand == 0 and (cand * dh) % 128 == 0:
            hg = cand
            break
    out_shape = jax.ShapeDtypeStruct((B, L, D), jnp.bfloat16)
    if hg is None:
        # Head dim not 128-groupable (tiny configs): full-D blocks per batch.
        return pl.pallas_call(
            functools.partial(_attn_full_kernel, num_heads=num_heads,
                              scale=scale),
            grid=(B,),
            in_specs=[pl.BlockSpec((1, L, D3), lambda b: (b, 0, 0)),
                      pl.BlockSpec((1, 1, L), lambda b: (b, 0, 0))],
            out_specs=pl.BlockSpec((1, L, D), lambda b: (b, 0, 0)),
            out_shape=out_shape,
            compiler_params=pltpu.CompilerParams(
                dimension_semantics=("parallel",),
                vmem_limit_bytes=_VMEM_LIMIT),
        )(qkv, mask_bias)

    gw = hg * dh
    n_groups = num_heads // hg
    # The packed qkv array is passed three times; BlockSpecs slice the Q / K /
    # V sections on the lane axis, so only the needed (1, L, gw) tiles are
    # DMA'd per grid step -- no XLA-level split of the QKV projection output.
    return pl.pallas_call(
        functools.partial(_attn_group_kernel, heads_per_group=hg, scale=scale),
        grid=(B, n_groups),
        in_specs=[
            pl.BlockSpec((1, L, gw), lambda b, g: (b, 0, g)),
            pl.BlockSpec((1, L, gw), lambda b, g: (b, 0, n_groups + g)),
            pl.BlockSpec((1, L, gw), lambda b, g: (b, 0, 2 * n_groups + g)),
            pl.BlockSpec((1, 1, L), lambda b, g: (b, 0, 0)),
        ],
        out_specs=pl.BlockSpec((1, L, gw), lambda b, g: (b, 0, g)),
        out_shape=out_shape,
        compiler_params=pltpu.CompilerParams(
            dimension_semantics=("parallel", "parallel"),
            vmem_limit_bytes=_VMEM_LIMIT),
    )(qkv, qkv, qkv, mask_bias)


# ----------------- fused tail: CLS+mean pooling + DenseNet classification head
def _tail_kernel(*refs, n_inner, eps_bn):
    x_ref, m_ref = refs[0], refs[1]
    o_ref = refs[-1]
    p_refs = refs[2:-1]

    x = x_ref[0].astype(jnp.float32)                    # (L, D)
    m = m_ref[0].astype(jnp.float32)                    # (1, L)
    cls_vec = x[0:1, :]                                 # CLSPooling (cls_first)
    summ = jnp.dot(m, x, preferred_element_type=jnp.float32)       # (1, D)
    denom = jnp.maximum(jnp.sum(m, axis=-1, keepdims=True), 1e-9)  # clamp 1e-9
    h = jnp.concatenate([cls_vec, summ / denom], axis=-1)          # (1, 2D)

    i = 0
    for _ in range(n_inner):                            # Linear + BN + ReLU
        w, b, g, be, rm, rv = p_refs[i:i + 6]
        i += 6
        h = jnp.dot(h, w[...], preferred_element_type=jnp.float32) + b[...]
        h = (h - rm[...]) * jax.lax.rsqrt(rv[...] + eps_bn) * g[...] + be[...]
        h = jnp.maximum(h, 0.0)

    w, b = p_refs[i], p_refs[i + 1]                     # final Linear + Softmax
    y = jnp.dot(h, w[...], preferred_element_type=jnp.float32) + b[...]
    y = y - jnp.max(y, axis=-1, keepdims=True)
    e = jnp.exp(y)
    o_ref[0] = e / jnp.sum(e, axis=-1, keepdims=True)   # exact normalization


def classification_tail(token_embeddings, mask_f3, head_params):
    """(B,L,D) tokens + mask -> pooled ['cls','mean'] -> DenseNet -> (B, C)."""
    B, L, D = token_embeddings.shape
    n_inner = len(head_params) - 1
    n_classes = head_params[-1]["w"].shape[1]

    args = [token_embeddings, mask_f3]
    in_specs = [pl.BlockSpec((1, L, D), lambda b: (b, 0, 0)),
                pl.BlockSpec((1, 1, L), lambda b: (b, 0, 0))]
    for hp in head_params[:-1]:
        K, N = hp["w"].shape
        args += [hp["w"], hp["b"].reshape(1, N), hp["bn_g"], hp["bn_b"],
                 hp["bn_rm"], hp["bn_rv"]]
        in_specs += ([pl.BlockSpec((K, N), lambda b: (0, 0))]
                     + [pl.BlockSpec((1, N), lambda b: (0, 0))] * 5)
    hp = head_params[-1]
    K, N = hp["w"].shape
    args += [hp["w"], hp["b"].reshape(1, N)]
    in_specs += [pl.BlockSpec((K, N), lambda b: (0, 0)),
                 pl.BlockSpec((1, N), lambda b: (0, 0))]

    out = pl.pallas_call(
        functools.partial(_tail_kernel, n_inner=n_inner, eps_bn=EPS_BN),
        grid=(B,),
        in_specs=in_specs,
        out_specs=pl.BlockSpec((1, 1, n_classes), lambda b: (b, 0, 0)),
        out_shape=jax.ShapeDtypeStruct((B, 1, n_classes), jnp.float32),
        compiler_params=pltpu.CompilerParams(dimension_semantics=("parallel",)),
    )(*args)
    return out.reshape(B, n_classes)


# --------------------------------------------------------------- model forward
def encoder_layer(x, mask_bias, p, B, L, num_heads):
    D = x.shape[1]
    # fused QKV projection -> (B*L, 3D) bf16, lane-dense
    qkv = dense(x, p["wqkv"], p["bqkv"], out_dtype=jnp.bfloat16)
    ctx = attention(qkv.reshape(B, L, 3 * D), mask_bias, num_heads=num_heads)
    ctx = ctx.reshape(B * L, D)
    # attention output projection fused with residual-add + LayerNorm (bf16 out)
    x = dense_add_layernorm(ctx, p["wo"], p["bo"], x, p["ln1_g"], p["ln1_b"])
    # FFN: up-proj + GELU, then down-proj fused with residual-add + LayerNorm
    ff = dense(x, p["w1"], p["b1"], activation="gelu", out_dtype=jnp.bfloat16)
    x = dense_add_layernorm(ff, p["w2"], p["b2"], x, p["ln2_g"], p["ln2_b"])
    return x


def bert_for_sequence_classification(params, input_ids, attention_mask, *, num_heads):
    B, L = input_ids.shape
    D = params["word_emb"].shape[1]

    # embeddings (gather is XLA glue; +pos +type +LayerNorm is one Pallas kernel)
    we = jnp.take(params["word_emb"], input_ids, axis=0)        # (B, L, D)
    x = embed_layernorm(we, params["pos_emb"][:L], params["type_emb"][0:1],
                        params["emb_ln_g"], params["emb_ln_b"])  # bf16
    x = x.reshape(B * L, D)                                      # lane-dense stream

    mask_f = attention_mask.astype(jnp.float32)
    mask_bias = ((1.0 - mask_f) * MASK_BIAS).reshape(B, 1, L)    # precomputed once

    for lp in params["layers"]:
        x = encoder_layer(x, mask_bias, lp, B, L, num_heads)

    token_embeddings = x.reshape(B, L, D)                        # BertModel output[0]

    # pooling_list = ['cls', 'mean'] + DenseNet head fused into one kernel
    return classification_tail(token_embeddings, mask_f.reshape(B, 1, L),
                               params["head"])


# ------------------------------------------------------------------ parameters
def init_params(key, *, vocab, D, n_layers, inter, max_len,
                hidden_head_layer_sizes, n_classes, n_poolings):
    keys = iter(jax.random.split(key, 1024))
    f32, bf16 = jnp.float32, jnp.bfloat16

    def nrm(shape, dtype=f32, scale=0.02):
        return (scale * jax.random.normal(next(keys), shape)).astype(dtype)

    params = {
        "word_emb": nrm((vocab, D)),
        "pos_emb": nrm((max_len, D)),
        "type_emb": nrm((2, D)),
        "emb_ln_g": jnp.ones((1, D), f32),
        "emb_ln_b": jnp.zeros((1, D), f32),
        "layers": [],
        "head": [],
    }
    for _ in range(n_layers):
        wq, wk, wv = nrm((D, D), bf16), nrm((D, D), bf16), nrm((D, D), bf16)
        params["layers"].append({
            "wqkv": jnp.concatenate([wq, wk, wv], axis=1),   # fused (D, 3D) bf16
            "bqkv": jnp.zeros((3 * D,), f32),
            "wo": nrm((D, D), bf16), "bo": jnp.zeros((D,), f32),
            "ln1_g": jnp.ones((1, D), f32), "ln1_b": jnp.zeros((1, D), f32),
            "w1": nrm((D, inter), bf16), "b1": jnp.zeros((inter,), f32),
            "w2": nrm((inter, D), bf16), "b2": jnp.zeros((D,), f32),
            "ln2_g": jnp.ones((1, D), f32), "ln2_b": jnp.zeros((1, D), f32),
        })
    feats = [D * n_poolings] + list(hidden_head_layer_sizes) + [n_classes]
    for i in range(len(feats) - 1):
        fin, fout = feats[i], feats[i + 1]
        layer = {"w": nrm((fin, fout)), "b": jnp.zeros((fout,), f32)}
        if i < len(feats) - 2:          # inner layers: batch_norm_inner=True
            layer.update({
                "bn_g": jnp.ones((1, fout), f32), "bn_b": jnp.zeros((1, fout), f32),
                "bn_rm": jnp.zeros((1, fout), f32), "bn_rv": jnp.ones((1, fout), f32),
            })
        params["head"].append(layer)
    return params


if __name__ == "__main__":
    B, L = 2, 8                      # batch, max_len (already tokenized)
    VOCAB, D, HEADS, LAYERS, INTER = 30, 128, 2, 2, 256
    N_CLASSES = 3
    HIDDEN_HEAD = [16]               # hidden_head_layer_sizes
    POOLING_LIST = ["cls", "mean"]   # number_of_poolings_methods = 2

    key = jax.random.PRNGKey(0)
    pkey, ikey = jax.random.split(key)
    params = init_params(pkey, vocab=VOCAB, D=D, n_layers=LAYERS, inter=INTER,
                         max_len=L, hidden_head_layer_sizes=HIDDEN_HEAD,
                         n_classes=N_CLASSES, n_poolings=len(POOLING_LIST))

    # TODO(synk): string tokenization (AutoTokenizer) has no Pallas equivalent;
    # deterministic integer ids / mask stand in for `tokenize(...)` output.
    input_ids = jax.random.randint(ikey, (B, L), 0, VOCAB, dtype=jnp.int32)
    lengths = jnp.array([L, 5], dtype=jnp.int32)
    attention_mask = (jnp.arange(L)[None, :] < lengths[:, None]).astype(jnp.int32)

    out = bert_for_sequence_classification(params, input_ids, attention_mask,
                                           num_heads=HEADS)
    out = jax.block_until_ready(out)

    assert out.shape == (B, N_CLASSES)
    assert bool(jnp.all(jnp.isfinite(out)))
    row_sums = jnp.sum(out, axis=1)
    assert bool(jnp.all(jnp.abs(row_sums - 1.0) < 1e-4))   # softmax head
    print("KERNEL_OK")
</pallas_src>

<mosaic_0001>
module attributes {stable_mosaic.version = 11 : i64} {
  func.func @_emb_ln_kernel(%arg0: i32, %arg1: memref<1x8x128xf32, #tpu.memory_space<vmem>>, %arg2: memref<8x128xf32, #tpu.memory_space<vmem>>, %arg3: memref<1x128xf32, #tpu.memory_space<vmem>>, %arg4: memref<1x128xf32, #tpu.memory_space<vmem>>, %arg5: memref<1x128xf32, #tpu.memory_space<vmem>>, %arg6: memref<1x8x128xbf16, #tpu.memory_space<vmem>>) attributes {dimension_semantics = [#tpu.dimension_semantics<parallel>], iteration_bounds = array<i64: 2>, scalar_prefetch = 0 : i64, scratch_operands = 0 : i64, tpu.core_type = #tpu.core_type<tc>, window_params = [{transform_indices = @transform_0, window_bounds = array<i64: 1, 8, 128>}, {pipeline_mode = #tpu.pipeline_mode<synchronous>, transform_indices = @transform_1, window_bounds = array<i64: 8, 128>}, {pipeline_mode = #tpu.pipeline_mode<synchronous>, transform_indices = @transform_2, window_bounds = array<i64: 1, 128>}, {pipeline_mode = #tpu.pipeline_mode<synchronous>, transform_indices = @transform_3, window_bounds = array<i64: 1, 128>}, {pipeline_mode = #tpu.pipeline_mode<synchronous>, transform_indices = @transform_4, window_bounds = array<i64: 1, 128>}, {transform_indices = @transform_5, window_bounds = array<i64: 1, 8, 128>}]} {
    %c0 = arith.constant 0 : index
    %c0_0 = arith.constant 0 : index
    %c0_1 = arith.constant 0 : index
    %0 = vector.load %arg1[%c0, %c0_0, %c0_1] : memref<1x8x128xf32, #tpu.memory_space<vmem>>, vector<1x8x128xf32>
    %1 = vector.shape_cast %0 : vector<1x8x128xf32> to vector<8x128xf32>
    %c0_2 = arith.constant 0 : index
    %c0_3 = arith.constant 0 : index
    %2 = vector.load %arg2[%c0_2, %c0_3] : memref<8x128xf32, #tpu.memory_space<vmem>>, vector<8x128xf32>
    %3 = arith.addf %1, %2 : vector<8x128xf32>
    %c0_4 = arith.constant 0 : index
    %c0_5 = arith.constant 0 : index
    %4 = vector.load %arg3[%c0_4, %c0_5] : memref<1x128xf32, #tpu.memory_space<vmem>>, vector<1x128xf32>
    %5 = vector.broadcast %4 : vector<1x128xf32> to vector<8x128xf32>
    %6 = arith.addf %3, %5 : vector<8x128xf32>
    %cst = arith.constant dense<0.000000e+00> : vector<8xf32>
    %7 = vector.multi_reduction <add>, %6, %cst [1] : vector<8x128xf32> to vector<8xf32>
    %8 = vector.shape_cast %7 : vector<8xf32> to vector<8x1xf32>
    %cst_6 = arith.constant 1.280000e+02 : f32
    %9 = vector.broadcast %cst_6 : f32 to vector<8x1xf32>
    %10 = arith.divf %8, %9 : vector<8x1xf32>
    %11 = vector.broadcast %10 : vector<8x1xf32> to vector<8x128xf32>
    %12 = arith.subf %6, %11 : vector<8x128xf32>
    %13 = arith.mulf %12, %12 : vector<8x128xf32>
    %cst_7 = arith.constant dense<0.000000e+00> : vector<8xf32>
    %14 = vector.multi_reduction <add>, %13, %cst_7 [1] : vector<8x128xf32> to vector<8xf32>
    %15 = vector.shape_cast %14 : vector<8xf32> to vector<8x1xf32>
    %cst_8 = arith.constant 1.280000e+02 : f32
    %16 = vector.broadcast %cst_8 : f32 to vector<8x1xf32>
    %17 = arith.divf %15, %16 : vector<8x1xf32>
    %18 = vector.broadcast %10 : vector<8x1xf32> to vector<8x128xf32>
    %19 = arith.subf %6, %18 : vector<8x128xf32>
    %cst_9 = arith.constant 9.99999996E-13 : f32
    %20 = vector.broadcast %cst_9 : f32 to vector<8x1xf32>
    %21 = arith.addf %17, %20 : vector<8x1xf32>
    %22 = math.rsqrt %21 : vector<8x1xf32>
    %23 = vector.broadcast %22 : vector<8x1xf32> to vector<8x128xf32>
    %24 = arith.mulf %19, %23 : vector<8x128xf32>
    %c0_10 = arith.constant 0 : index
    %c0_11 = arith.constant 0 : index
    %25 = vector.load %arg4[%c0_10, %c0_11] : memref<1x128xf32, #tpu.memory_space<vmem>>, vector<1x128xf32>
    %26 = vector.broadcast %25 : vector<1x128xf32> to vector<8x128xf32>
    %27 = arith.mulf %24, %26 : vector<8x128xf32>
    %c0_12 = arith.constant 0 : index
    %c0_13 = arith.constant 0 : index
    %28 = vector.load %arg5[%c0_12, %c0_13] : memref<1x128xf32, #tpu.memory_space<vmem>>, vector<1x128xf32>
    %29 = vector.broadcast %28 : vector<1x128xf32> to vector<8x128xf32>
    %30 = arith.addf %27, %29 : vector<8x128xf32>
    %31 = arith.truncf %30 : vector<8x128xf32> to vector<8x128xbf16>
    %c0_14 = arith.constant 0 : index
    %c0_15 = arith.constant 0 : index
    %c0_16 = arith.constant 0 : index
    %32 = vector.load %arg6[%c0_14, %c0_15, %c0_16] : memref<1x8x128xbf16, #tpu.memory_space<vmem>>, vector<1x8x128xbf16>
    %33 = vector.shape_cast %32 : vector<1x8x128xbf16> to vector<8x128xbf16>
    %34 = vector.shape_cast %31 : vector<8x128xbf16> to vector<1x8x128xbf16>
    tpu.vector_store %arg6[%c0_14, %c0_15, %c0_16], %34 {strides = array<i32>} : memref<1x8x128xbf16, #tpu.memory_space<vmem>>, vector<1x8x128xbf16>,
    return
  }
  func.func @transform_0(%arg0: i32) -> (i32, i32, i32) {
    %c0_i32 = arith.constant 0 : i32
    %c0_i32_0 = arith.constant 0 : i32
    %c0_i32_1 = arith.constant 0 : i32
    return %arg0, %c0_i32, %c0_i32_0 : i32, i32, i32
  }
  func.func @transform_1(%arg0: i32) -> (i32, i32) {
    %c0_i32 = arith.constant 0 : i32
    %c0_i32_0 = arith.constant 0 : i32
    %c0_i32_1 = arith.constant 0 : i32
    return %c0_i32, %c0_i32_0 : i32, i32
  }
  func.func @transform_2(%arg0: i32) -> (i32, i32) {
    %c0_i32 = arith.constant 0 : i32
    %c0_i32_0 = arith.constant 0 : i32
    %c0_i32_1 = arith.constant 0 : i32
    return %c0_i32, %c0_i32_0 : i32, i32
  }
  func.func @transform_3(%arg0: i32) -> (i32, i32) {
    %c0_i32 = arith.constant 0 : i32
    %c0_i32_0 = arith.constant 0 : i32
    %c0_i32_1 = arith.constant 0 : i32
    return %c0_i32, %c0_i32_0 : i32, i32
  }
  func.func @transform_4(%arg0: i32) -> (i32, i32) {
    %c0_i32 = arith.constant 0 : i32
    %c0_i32_0 = arith.constant 0 : i32
    %c0_i32_1 = arith.constant 0 : i32
    return %c0_i32, %c0_i32_0 : i32, i32
  }
  func.func @transform_5(%arg0: i32) -> (i32, i32, i32) {
    %c0_i32 = arith.constant 0 : i32
    %c0_i32_0 = arith.constant 0 : i32
    %c0_i32_1 = arith.constant 0 : i32
    return %arg0, %c0_i32, %c0_i32_0 : i32, i32, i32
  }
}

</mosaic_0001>

<bundles_post_ra>
// kernel: tpu_custom_call.1
= control target key start
LH: loop header
LB: loop body
LE: loop exit
PB: predicated region body
PF: predicated region fallthrough
CT: control target
= control target key end

     0   :  { %10 = vsyncpa [#allocation3], 0  ;;  %s791_s0 = inlined_call_operand.hbm [shape: f32[2,8,128], index: 0, kind: input, shape index: {}]   ;;  %s792_s1 = inlined_call_operand.hbm [shape: f32[8,128], index: 1, kind: input, shape index: {}]   ;;  %s793_s2 = inlined_call_operand.vmem [shape: f32[1,128], index: 2, kind: input, shape index: {}]   ;;  %s794_s3 = inlined_call_operand.vmem [shape: f32[1,128], index: 3, kind: input, shape index: {}]   ;;  %s795_s4 = inlined_call_operand.vmem [shape: f32[1,128], index: 4, kind: input, shape index: {}]   ;;  %s796_s5 = inlined_call_operand.hbm [shape: bf16[2,8,128], index: 5, kind: output, shape index: {}]  }
   0x1   :  { %12 = vsyncpa [#allocation3 + $0x1], 0 }
   0x2   :  { %13 = vsyncpa [#allocation6], 0 }
   0x3   :  { %14 = vsyncpa [#allocation4], 0 }
   0x4   :  { %16 = vsyncpa [#allocation4 + $0x1], 0  ;;  %s643_s18 = smov 0   ;;  %s645_s19 = smov 0  }
   0x5   :  { %s647_s20 = smov 0   ;;  %s649_s21 = smov 0  }
   0x6 LB: > { %s664_s22 = sadd.s32 4294967295, %s609_s21   ;;  %s400_s23 = sadd.s32 4294967294, %s609_s21   ;;  %s609_s21 = sphi %s649_s21, %s806_s21   ;;  %s605_s20 = sphi %s647_s20, %s805_s20   ;;  %s601_s19 = sphi %s645_s19, %s804_s19   ;;  %s597_s18 = sphi %s643_s18, %s803_s18  }
   0x7   : > { %p42_p0 = scmp.ne.s32.totalorder %s601_s19, %s597_s18  ;;  %p43_p1 = scmp.eq.s32.totalorder %s664_s22, 0 }
   0x8   : > { %p150_p2 = scmp.eq.s32.totalorder %s664_s22, 1  ;;  %p156_p3 = scmp.eq.s32.totalorder %s400_s23, 1 }
   0x9   : > { %p673_p4 = por %p43_p1, %p42_p0  ;;  %p401_p5 = scmp.ge.s32.totalorder %s609_s21, 1 }
   0xa   : > { %p678_p6 = por %p156_p3, %p42_p0  ;;  %p163_p7 = scmp.lt.s32.totalorder %s609_s21, 3 }
   0xb   : > { %s175_s28 = sshll.u32 %s792_s1, 4  ;;  %s611_s30 = smov [#allocation5]   ;;  %s176_s28 = int_to_ptr.hbm [resolvable:$true] %s175_s28 }
   0xc   : > { %p686_p8 = pnand %p401_p5, %p163_p7  ;;  %s177_s6 = sshll.u32 %s611_s30, 4  ;;  %s178_s6 = int_to_ptr.vmem [resolvable:$true] %s177_s6 }
   0xd   : > { %s696_s7 = sadd.s32 1, %s609_s21   ;;  %s29_s8 = sadd.s32 1, %s605_s20 }
   0xe   : > { %p422_p10 = pneg %p686_p8  ;;  %s26_s9 = ssub.s32 %s609_s21, %s696_s7 }
   0xf   : > { %p27_p12 = scmp.eq.s32.totalorder %s26_s9, 0  ;;  %p36_p13 = scmp.ne.s32.totalorder %s605_s20, %s601_s19 }
  0x10   : > { %p423_p11 = pnand %p422_p10, %p43_p1  ;;  %p37_p0 = scmp.eq.s32.totalorder %s609_s21, 0 }
  0x11   : > { %s705_s10 = scalar_select %p27_p12, %s605_s20, %s29_s8  }
  0x12   : > { %425 = dma.hbm_to_vmem [thread:$0]  (!%p423_p11), %s176_s28, 128, %s178_s6, [#allocation6]  }
  0x13   : > { %p709_p3 = por %p150_p2, %p36_p13  ;;  %p435_p5 = scmp.lt.s32.totalorder %s609_s21, 2 }
  0x14   : > { %s197_s12 = sand.u32 1, %s605_s20   ;;  %s405_s13 = sshll.u32 %s609_s21, 3 }
  0x15   : > { %p38_p7 = por %p37_p0, %p36_p13  ;;  %s404_s14 = sshll.u32 %s197_s12, 3 }
  0x16   : > { %s205_s17 = scalar_lea.hbm %s791_s0, %s405_s13  ;;  %s201_s26 = scalar_lea.vmem [#allocation2], %s404_s14 }
  0x17   : > { %s207_s23 = sshll.u32 %s205_s17, 4  ;;  %s209_s27 = sshll.u32 %s201_s26, 4  ;;  %s208_s23 = int_to_ptr.hbm [resolvable:$true] %s207_s23  ;;  %s210_s27 = int_to_ptr.vmem [resolvable:$true] %s209_s27 }
  0x18   : > { %p719_p10 = pnand %p435_p5, %p38_p7  ;;  %s198_s30 = scalar_lea.sflag [#allocation3], %s197_s12 }
  0x19   : > { %s509_s6 = sshra.s32 %s208_s23, 4  ;;  %s516_s14 = scalar_lea.hbm %s791_s0, 16  ;;  %s510_s6 = int_to_ptr.hbm [resolvable:$true] %s509_s6 }
  0x1a   : > { %s511_s8 = scalar_lea.hbm %s510_s6, 8  ;;  %p513_p11 = pneg %p719_p10 }
  0x1b   : > { %p512_p2 = scmp.ne.s32.totalorder %s510_s6, %s511_s8  ;;  %p517_p0 = scmp.lt.s32.totalorder %s510_s6, %s791_s0 }
  0x1c   : > { %p518_p5 = scmp.lt.s32.totalorder %s516_s14, %s511_s8 }
  0x1d   : > { %p514_p12 = pnand %p513_p11, %p512_p2 }
  0x1e   : > { %p519_p7 = por %p518_p5, %p517_p0 }
  0x1f   : > { %p515_p13 = pneg %p514_p12 }
  0x21   : > { %p520_p9 = pnand %p519_p7, %p515_p13 }
  0x23   : > { %523 = shalt.err (!%p520_p9)
}
  0x24   : > { %429 = dma.hbm_to_vmem [thread:$0]  (!%p719_p10), %s208_s23, 128, %s210_s27, %s198_s30  }
  0x25   : > { %218 = sbr.rel (%p686_p8) target bundleno = 321 (0x141), region = 40  ;;  %s736_s12 = sand.u32 (!%p686_p8), 1, %s601_s19  }
  0x26   : > { %s407_s17 = sshll.u32 (!%p686_p8), %s736_s12, 3  ;;  %s221_s26 = scalar_lea.sflag (!%p686_p8), [#allocation3], %s736_s12 }
  0x27   : > { %s224_s9 = scalar_lea.vmem (!%p686_p8), [#allocation2], %s407_s17 }
  0x2a   : > { %584 = dma.done.wait (%p673_p4), %s221_s26, 128  }
  0x2b   : > { %586 = vsyncadd (%p673_p4), %s221_s26, 4294967168 }
  0x2c   : > { %588 = dma.done.wait (%p43_p1), [#allocation6], 128  }
  0x2d   : > { %590 = vsyncadd (%p43_p1), [#allocation6], 4294967168  ;;  %v257_v0 = vld [vmem:[%s224_s9] sm:$0xff]  ;;  %v258_v1 = vld [vmem:[#allocation5] sm:$0xff]  ;;  %v612_v5 = vmov 128.0   ;;  %s409_s24 = sshll.u32 %s736_s12, 2 }
  0x2e   : > { %v259_v2 = vadd.f32 %v258_v1, %v257_v0  ;;  %v472_v3 = vld [vmem:[%s793_s2] ss:$0 sm:$0xff]  ;;  %475 = vrcp.f32 %v612_v5  ;;  %s411_s27 = sshll.u32 %s664_s22, 2  ;;  %s256_s16 = scalar_lea.vmem [#allocation7], %s409_s24 }
  0x2f   : > { %v473_v25 = vld [vmem:[%s794_s3] ss:$0 sm:$0xff]  ;;  %s315_s15 = scalar_lea.hbm %s796_s5, %s411_s27  ;;  %s317_s22 = sshll.u32 %s256_s16, 4  ;;  %s318_s22 = int_to_ptr.vmem [resolvable:$true] %s317_s22 }
  0x30   : > { %v264_v4 = vadd.f32 %v472_v3, %v259_v2  ;;  %v474_v28 = vld [vmem:[%s795_s4] ss:$0 sm:$0xff]  ;;  %s319_s17 = sshll.u32 %s315_s15, 4  ;;  %s305_s26 = scalar_lea.sflag [#allocation4], %s736_s12  ;;  %s320_s17 = int_to_ptr.hbm [resolvable:$true] %s319_s17 }
  0x31   : > { %s553_s9 = sshra.s32 %s320_s17, 4  ;;  %s559_s27 = scalar_lea.hbm %s796_s5, 8  ;;  %s554_s9 = int_to_ptr.hbm [resolvable:$true] %s553_s9 }
  0x32   : > { %265 = vadd.xlane.f32.xlu0 %v264_v4  ;;  %s555_s29 = scalar_lea.hbm %s554_s9, 4  ;;  %p560_p9 = scmp.lt.s32.totalorder %s554_s9, %s796_s5 }
  0x33   : > { %p556_p1 = scmp.ne.s32.totalorder %s554_s9, %s555_s29  ;;  %p561_p10 = scmp.lt.s32.totalorder %s559_s27, %s555_s29 }
  0x34   : > { %v476_v6 = vpop.eup %475 }
  0x35   : > { %v268_v7 = vmul.f32 128.0, %v476_v6  ;;  %vm272_vm0 = vweird.f32 %v476_v6  ;;  %p557_p4 = pnand %p556_p1, %p709_p3  ;;  %p562_p2 = por %p561_p10, %p560_p9 }
  0x37   : > { %v269_v8 = vsub.f32 1.0, %v268_v7  ;;  %p558_p8 = pneg %p557_p4 }
  0x39   : > { %v270_v9 = vmul.f32 %v476_v6, %v269_v8  ;;  %p563_p11 = pnand %p562_p2, %p558_p8 }
  0x3b   : > { %v271_v10 = vadd.f32 %v476_v6, %v270_v9 }
  0x3d   : > { %v273_v11 = vsel %vm272_vm0, %v476_v6, %v271_v10 }
  0xa5   : > { %v266_v12 = vpop.xlane.xlu0 %265 }
  0xa6   : > { %v274_v13 = vmul.f32 %v273_v11, %v266_v12 }
  0xa8   : > { %v275_v14 = vsub.f32 %v264_v4, %v274_v13 }
  0xaa   : > { %v276_v15 = vmul.f32 %v275_v14, %v275_v14 }
  0xac   : > { %277 = vadd.xlane.f32.xlu0 %v276_v15 }
 0x11f   : > { %v278_v16 = vpop.xlane.xlu0 %277 }
 0x120   : > { %v279_v17 = vmul.f32 %v278_v16, %v273_v11 }
 0x122   : > { %v280_v18 = vadd.f32 1e-12, %v279_v17 }
 0x124   : > { %477 = vrsqrt.f32 %v280_v18  ;;  %vm287_vm2 = vweird.f32 %v280_v18 }
 0x12a   : > { %v478_v19 = vpop.eup %477 }
 0x12b   : > { %v282_v20 = vmul.f32 %v478_v19, %v280_v18  ;;  %vm288_vm1 = vweird.f32 %v478_v19 }
 0x12c   : > { %vm289_vm3 = vmor %vm287_vm2, %vm288_vm1 }
 0x12d   : > { %v283_v21 = vmul.f32 %v478_v19, %v282_v20 }
 0x12f   : > { %v284_v22 = vmul.f32 0.5, %v283_v21 }
 0x131   : > { %v285_v23 = vsub.f32 1.5, %v284_v22 }
 0x133   : > { %v286_v24 = vmul.f32 %v478_v19, %v285_v23 }
 0x135   : > { %v290_v26 = vsel %vm289_vm3, %v478_v19, %v286_v24 }
 0x136   : > { %v291_v27 = vmul.f32 %v290_v26, %v275_v14 }
 0x138   : > { %v296_v29 = vmul.f32 %v473_v25, %v291_v27 }
 0x13a   : > { %v301_v30 = vadd.f32 %v474_v28, %v296_v29 }
 0x13c   : > { %v302_v31 = vpack.c.bf16 %v301_v30, %v301_v30 }
 0x13e   : > { %303 = vst [vmem:[%s256_s16] sm:$0xf] %v302_v31 }
 0x13f   : > { %566 = shalt.err (!%p563_p11)
}
 0x140   : > { %420 = dma.vmem_to_hbm [thread:$0]  (%p709_p3), %s318_s22, 64, %s320_s17, %s305_s26  }
 0x141 PF: > { %s331_s12 = sand.u32 1, %s597_s18   ;;  %p802_p12 = scmp.ge.s32.totalorder %s609_s21, 2 }
 0x142   : > { %s332_s6 = scalar_lea.sflag [#allocation4], %s331_s12 }
 0x143   : > { %p431_p13 = pnand %p802_p12, %p678_p6 }
 0x145   : > { %p432_p0 = pneg %p431_p13 }
 0x147   : > { %592 = dma.done.wait (%p432_p0), %s332_s6, 64  }
 0x148   : > { %594 = vsyncadd (%p432_p0), %s332_s6, 4294967232  ;;  %p19_p5 = scmp.ge.s32.totalorder %s696_s7, 4   ;;  %s803_s18 = smov %s601_s19 }
 0x149   : > { %s804_s19 = smov %s605_s20  ;;  %s805_s20 = smov %s705_s10 }
 0x14a   : > { %s806_s21 = smov %s696_s7  ;;  %21 = sbr.rel (!%p19_p5) target bundleno = 6 (0x6), region = 89 }
 0x14f   :  { %338 = vsyncpa [#allocation3], 1 }
 0x150   :  { %340 = vsyncpa [#allocation3 + $0x1], 1 }
 0x151   :  { %341 = vsyncpa [#allocation6], 1 }
 0x152   :  { %342 = vsyncpa [#allocation4], 1 }
 0x153   :  { %344 = vsyncpa [#allocation4 + $0x1], 1 }

</bundles_post_ra>
